<compile_context>
chip_gen: v7x
topology: tpu7x:2x2x1
jax: 0.10.0
libtpu: 0.0.40
codegen_flags: <defaults>
</compile_context>

<pallas_src>
import functools

import jax
import jax.numpy as jnp
from jax.experimental import pallas as pl
from jax.experimental.pallas import tpu as pltpu


def _adaptive_elu_kernel(x_ref, o_ref, *, xshift, yshift):
    # Compute in f32 (v5e EUP has no bf16 exp); I/O stays in the native dtype.
    z = x_ref[...].astype(jnp.float32) - xshift
    # ELU(alpha=1): z if z > 0 else exp(z) - 1.  exp is taken on min(z, 0) so
    # large positives can never overflow.  yshift is folded into both branches.
    neg = jnp.minimum(z, 0.0)
    y = jnp.where(z > 0, z + yshift, jnp.exp(neg) + (yshift - 1.0))
    o_ref[...] = y.astype(o_ref.dtype)


def adaptive_elu(x, xshift: float, yshift: float):
    """Elementwise ELU(x - xshift) + yshift via a Pallas TPU kernel.

    Accepts any shape (e.g. NCHW).  The array is viewed as a lane-dense
    (rows, 128) slab in its native dtype and streamed through a tiled
    elementwise kernel; the original shape is restored at the end.
    """
    orig_shape = x.shape
    orig_dtype = x.dtype
    n = x.size

    LANES = 128

    flat = jnp.ravel(x)
    if n % LANES != 0:
        # Rare tail case: pad only up to the next lane multiple (tiny copy).
        flat = jnp.pad(flat, (0, LANES - (n % LANES)))
    rows = flat.size // LANES
    x2d = flat.reshape(rows, LANES)

    # Sublane alignment: 8 for 4-byte dtypes, 16 for 2-byte, 32 for 1-byte.
    itemsize = jnp.dtype(orig_dtype).itemsize
    sublane = max(8, 32 // max(int(itemsize), 1))

    # ~1 MiB (f32) / ~512 KiB (bf16) per block; double-buffered in + out stays
    # well under the scoped-VMEM default on every generation (incl. v7x).
    MAX_ROW_TILE = 2048
    row_tile = min(MAX_ROW_TILE, ((rows + sublane - 1) // sublane) * sublane)

    grid = (pl.cdiv(rows, row_tile),)

    kernel = functools.partial(
        _adaptive_elu_kernel, xshift=float(xshift), yshift=float(yshift)
    )

    out2d = pl.pallas_call(
        kernel,
        out_shape=jax.ShapeDtypeStruct((rows, LANES), orig_dtype),
        grid_spec=pltpu.PrefetchScalarGridSpec(
            num_scalar_prefetch=0,
            grid=grid,
            in_specs=[pl.BlockSpec((row_tile, LANES), lambda i: (i, 0))],
            out_specs=pl.BlockSpec((row_tile, LANES), lambda i: (i, 0)),
        ),
        compiler_params=pltpu.CompilerParams(
            dimension_semantics=("parallel",)
        ),
    )(x2d)

    out = out2d.reshape(-1)
    if out.size != n:
        out = out[:n]
    return out.reshape(orig_shape)


class AdaptiveELU:
    """JAX/Pallas equivalent of the PyTorch AdaptiveELU module."""

    def __init__(self, xshift: float, yshift: float):
        self.xshift = float(xshift)
        self.yshift = float(yshift)

    def __call__(self, x):
        return adaptive_elu(x, self.xshift, self.yshift)


if __name__ == "__main__":
    key = jax.random.PRNGKey(0)
    # NCHW input, small shapes
    x = jax.random.normal(key, (2, 4, 16, 16), dtype=jnp.float32) * 2.0

    xshift, yshift = 0.5, 1.0
    mod = AdaptiveELU(xshift, yshift)

    y = mod(x)
    y = jax.block_until_ready(y)

    # Reference check in plain JAX
    z = x - xshift
    ref = jnp.where(z > 0, z, jnp.exp(jnp.minimum(z, 0.0)) - 1.0) + yshift
    assert y.shape == x.shape and y.dtype == x.dtype
    assert jnp.allclose(y, ref, atol=1e-6, rtol=1e-6)

    print("KERNEL_OK")
</pallas_src>

<mosaic_0001>
module attributes {stable_mosaic.version = 11 : i64} {
  func.func @_adaptive_elu_kernel(%arg0: i32, %arg1: memref<16x128xf32, #tpu.memory_space<vmem>>, %arg2: memref<16x128xf32, #tpu.memory_space<vmem>>) attributes {dimension_semantics = [#tpu.dimension_semantics<parallel>], iteration_bounds = array<i64: 1>, scalar_prefetch = 0 : i64, scratch_operands = 0 : i64, tpu.core_type = #tpu.core_type<tc>, window_params = [{transform_indices = @transform_0, window_bounds = array<i64: 16, 128>}, {transform_indices = @transform_1, window_bounds = array<i64: 16, 128>}]} {
    %c0 = arith.constant 0 : index
    %c0_0 = arith.constant 0 : index
    %0 = vector.load %arg1[%c0, %c0_0] : memref<16x128xf32, #tpu.memory_space<vmem>>, vector<16x128xf32>
    %cst = arith.constant 5.000000e-01 : f32
    %1 = vector.broadcast %cst : f32 to vector<16x128xf32>
    %2 = arith.subf %0, %1 : vector<16x128xf32>
    %cst_1 = arith.constant 0.000000e+00 : f32
    %3 = vector.broadcast %cst_1 : f32 to vector<16x128xf32>
    %4 = arith.minimumf %2, %3 : vector<16x128xf32>
    %cst_2 = arith.constant 0.000000e+00 : f32
    %5 = vector.broadcast %cst_2 : f32 to vector<16x128xf32>
    %6 = arith.cmpf ogt, %2, %5 : vector<16x128xf32>
    %cst_3 = arith.constant 1.000000e+00 : f32
    %7 = vector.broadcast %cst_3 : f32 to vector<16x128xf32>
    %8 = arith.addf %2, %7 : vector<16x128xf32>
    %9 = math.exp %4 : vector<16x128xf32>
    %cst_4 = arith.constant 0.000000e+00 : f32
    %10 = vector.broadcast %cst_4 : f32 to vector<16x128xf32>
    %11 = arith.addf %9, %10 : vector<16x128xf32>
    %12 = arith.select %6, %8, %11 : vector<16x128xi1>, vector<16x128xf32>
    %c0_5 = arith.constant 0 : index
    %c0_6 = arith.constant 0 : index
    %13 = vector.load %arg2[%c0_5, %c0_6] : memref<16x128xf32, #tpu.memory_space<vmem>>, vector<16x128xf32>
    tpu.vector_store %arg2[%c0_5, %c0_6], %12 {strides = array<i32>} : memref<16x128xf32, #tpu.memory_space<vmem>>, vector<16x128xf32>,
    return
  }
  func.func @transform_0(%arg0: i32) -> (i32, i32) {
    %c0_i32 = arith.constant 0 : i32
    %c0_i32_0 = arith.constant 0 : i32
    return %arg0, %c0_i32 : i32, i32
  }
  func.func @transform_1(%arg0: i32) -> (i32, i32) {
    %c0_i32 = arith.constant 0 : i32
    %c0_i32_0 = arith.constant 0 : i32
    return %arg0, %c0_i32 : i32, i32
  }
}

</mosaic_0001>

<bundles_post_ra>
// kernel: tpu_custom_call.1
= control target key start
LH: loop header
LB: loop body
LE: loop exit
PB: predicated region body
PF: predicated region fallthrough
CT: control target
= control target key end

     0   :  { %6 = vsyncpa [#allocation3], 0  ;;  %s162_s0 = inlined_call_operand.hbm [shape: f32[16,128], index: 0, kind: input, shape index: {}]   ;;  %s163_s1 = inlined_call_operand.hbm [shape: f32[16,128], index: 1, kind: output, shape index: {}]  }
   0x1   :  { %7 = vsyncpa [#allocation4], 0  ;;  %s118_s6 = smov [#allocation2]   ;;  %s70_s10 = scalar_lea.hbm %s162_s0, 256 }
   0x2   :  { %s13_s7 = sshll.u32 %s118_s6, 4  ;;  %p71_p0 = scmp.ne.s32.totalorder %s162_s0, %s70_s10  ;;  %s14_s7 = int_to_ptr.vmem [resolvable:$true] %s13_s7 }
   0x3   :  { %p74_p1 = scmp.lt.u32.totalorder %s70_s10, %s162_s0 }
   0x5   :  { %p76_p2 = pnand %p74_p1, %p71_p0 }
   0x7   :  { %79 = shalt.err (!%p76_p2)
}
   0x8   :  { %s80_s15 = scalar_lea.vmem %s14_s7, 256  ;;  %p85_p4 = scmp.lt.s32.totalorder %s14_s7, %s14_s7 }
   0x9   :  { %p81_p3 = scmp.ne.s32.totalorder %s14_s7, %s80_s15  ;;  %p86_p5 = scmp.lt.s32.totalorder %s80_s15, %s80_s15 }
   0xb   :  { %p87_p6 = por %p86_p5, %p85_p4 }
   0xd   :  { %p88_p7 = pnand %p87_p6, %p81_p3 }
   0xf   :  { %91 = shalt.err (!%p88_p7)
}
  0x10   :  { %s119_s16 = smov 128   ;;  %s120_s17 = smov 8  }
  0x11   :  { %19 = dma.hbm_to_vmem [thread:$0]  %s162_s0, 256, %s14_s7, [#allocation3], %s119_s16, %s119_s16, %s120_s17  }
  0x12   :  { %114 = dma.done.wait [#allocation3], 256  }
  0x13   :  { %115 = vsyncadd [#allocation3], 4294967040  ;;  %v23_v0 = vld [vmem:[#allocation2] sm:$0xff]  ;;  %v24_v1 = vld [vmem:[#allocation2 + $0x8] sm:$0xff]  ;;  %s121_s20 = smov [#allocation5]  }
  0x14   :  { %v60_v2 = vadd.f32 -0.5, %v23_v0  ;;  %v61_v3 = vadd.f32 -0.5, %v24_v1  ;;  %s48_s21 = sshll.u32 %s121_s20, 4  ;;  %s49_s21 = int_to_ptr.vmem [resolvable:$true] %s48_s21 }
  0x15   :  { %s92_s0 = scalar_lea.vmem %s49_s21, 256  ;;  %p97_p9 = scmp.lt.s32.totalorder %s49_s21, %s49_s21 }
  0x16   :  { %v27_v4 = vmin.f32 %v60_v2, 0.0  ;;  %v28_v5 = vmin.f32 %v61_v3, 0.0  ;;  %v31_v8 = vadd.f32 1.0, %v60_v2  ;;  %vm29_vm0 = vcmp.gt.f32.partialorder %v60_v2, 0.0  ;;  %p93_p8 = scmp.ne.s32.totalorder %s49_s21, %s92_s0  ;;  %p98_p10 = scmp.lt.s32.totalorder %s92_s0, %s92_s0 }
  0x17   :  { %v32_v9 = vadd.f32 1.0, %v61_v3  ;;  %vm30_vm1 = vcmp.gt.f32.partialorder %v61_v3, 0.0 }
  0x18   :  { %v33_v6 = vmul.f32 1.442695, %v27_v4  ;;  %v35_v7 = vmul.f32 1.442695, %v28_v5  ;;  %p99_p11 = por %p98_p10, %p97_p9 }
  0x1a   :  { %66 = vpow2.f32 %v33_v6  ;;  %p100_p12 = pnand %p99_p11, %p93_p8 }
  0x1b   :  { %68 = vpow2.f32 %v35_v7 }
  0x24   :  { %v67_v10 = vpop.eup %66 }
  0x25   :  { %v69_v11 = vpop.eup %68  ;;  %v39_v12 = vsel %vm29_vm0, %v31_v8, %v67_v10 }
  0x26   :  { %41 = vst [vmem:[#allocation5] sm:$0xff] %v39_v12  ;;  %v40_v13 = vsel %vm30_vm1, %v32_v9, %v69_v11 }
  0x27   :  { %42 = vst [vmem:[#allocation5 + $0x8] sm:$0xff] %v40_v13 }
  0x28   :  { %103 = shalt.err (!%p100_p12)
}
  0x29   :  { %s104_s24 = scalar_lea.hbm %s163_s1, 256 }
  0x2a   :  { %p105_p13 = scmp.ne.s32.totalorder %s163_s1, %s104_s24  ;;  %p108_p0 = scmp.lt.u32.totalorder %s104_s24, %s163_s1 }
  0x2c   :  { %p110_p1 = pnand %p108_p0, %p105_p13 }
  0x2e   :  { %113 = shalt.err (!%p110_p1)
}
  0x2f   :  { %54 = dma.vmem_to_hbm [thread:$0]  %s49_s21, 256, %s163_s1, [#allocation4], %s119_s16, %s119_s16, %s120_s17  }
  0x30   :  { %116 = dma.done.wait [#allocation4], 256  }
  0x31   :  { %117 = vsyncadd [#allocation4], 4294967040 }
  0x32   :  { %58 = vsyncpa [#allocation3], 1 }
  0x33   :  { %59 = vsyncpa [#allocation4], 1 }

</bundles_post_ra>
